<compile_context>
chip_gen: v7x
topology: tpu7x:2x2x1
jax: 0.10.0
libtpu: 0.0.40
codegen_flags: <defaults>
</compile_context>

<pallas_src>
import functools

import jax
import jax.numpy as jnp
from jax.experimental import pallas as pl
from jax.experimental.pallas import tpu as pltpu

_NEG = -1e30  # "minus infinity" for padded class lanes (exp underflows to exactly 0)


def _round_up(n, m):
    return (n + m - 1) // m * m


def _pick_tb(B, D, Cp):
    """Largest batch tile (multiple of 8, <= 512) whose pipelined buffers fit a ~24 MiB budget."""
    w_bytes = 2 * D * Cp * 2                      # double-buffered bf16 weight block
    budget = 24 * 1024 * 1024
    tb = 512
    while tb > 8:
        x_bytes = 2 * tb * D * 4 + tb * D * 2     # pipelined x block + in-kernel bf16 copy
        cls_bytes = 8 * tb * Cp * 4               # y scratch + softmax temporaries
        if w_bytes + x_bytes + cls_bytes <= budget:
            break
        tb //= 2
    if B <= tb:
        tb = max(8, _round_up(B, 8))
    return tb


def _pimodel_kernel(x_ref, w_ref, b_ref, y_ref, mask_ref, scl_ref, out_ref, yscr_ref,
                    *, c_real, b_real):
    tb, cp = yscr_ref.shape

    # Row-validity mask for the (possibly ragged) final batch block: garbage rows are zeroed
    # BEFORE the matmul / exp so NaN/Inf bit patterns can never reach the reduction.
    row0 = pl.program_id(0) * tb
    row_ids = jax.lax.broadcasted_iota(jnp.int32, (tb, 1), 0) + row0
    row_valid = row_ids < b_real                                              # [TB, 1] bool

    # ---- model(x): linear head.  bf16 MXU operands (cast in-kernel), f32 accumulation. ----
    x = jnp.where(row_valid, x_ref[...], 0.0).astype(jnp.bfloat16)            # [TB, D]
    logits = jnp.dot(x, w_ref[...], preferred_element_type=jnp.float32) + b_ref[...]  # [TB, Cp]

    # ---- build the lane-dense teacher-logit tile in VMEM scratch (padded lanes = -1e30) ----
    yscr_ref[...] = jnp.full((tb, cp), _NEG, jnp.float32)
    yscr_ref[:, :c_real] = jnp.where(row_valid, y_ref[...], 0.0)              # masked lane store
    y = yscr_ref[...]                                                         # [TB, Cp]

    def softmax_rows(z):
        m = jnp.max(z, axis=1, keepdims=True)
        e = jnp.exp(z - m)
        return e / jnp.sum(e, axis=1, keepdims=True)                          # exact (mem-bound)

    p_hat = softmax_rows(logits)       # y_hat.softmax(1); padded lanes get exactly 0 mass
    p_tgt = softmax_rows(y)            # y.softmax(1).detach()

    # F.mse_loss(..., reduction='none').mean(1): padded lanes contribute exactly 0,
    # so sum over the padded lane axis and divide by the *real* class count.
    sq = (p_hat - p_tgt) ** 2
    mse = jnp.sum(sq, axis=1, keepdims=True) * jnp.float32(1.0 / c_real)      # [TB, 1]

    # target_weights = scl_weight[y.max(1)[1]]  (first-max index, PyTorch argmax semantics)
    lane_iota = jax.lax.broadcasted_iota(jnp.int32, (tb, cp), 1)              # [TB, Cp]
    maxv = jnp.max(y, axis=1, keepdims=True)
    idx = jnp.min(jnp.where(y == maxv, lane_iota, cp), axis=1, keepdims=True)  # [TB, 1]
    onehot = (lane_iota == idx).astype(jnp.float32)
    tw = jnp.sum(onehot * scl_ref[...], axis=1, keepdims=True)                # [TB, 1]

    # (target_weights * mse * mask).mean(): fold 1/B in, emit this block's partial sum to its
    # own lane-dense output block (safe under "parallel" grid semantics / v7x dual-TC).
    maskv = jnp.where(row_valid, mask_ref[...], 0.0)                          # NaN-safe row mask
    psum = jnp.sum(tw * mse * maskv, axis=0, keepdims=True) * jnp.float32(1.0 / b_real)  # [1,1]
    out_ref[...] = jnp.broadcast_to(psum, (8, 128))


def pi_model_loss(x, y, mask, w, b, scl_weight=None):
    """x: [B, Cin, H, W]  y: [B, C]  mask: [B]  w: [D, C]  b: [C]  scl_weight: [C] or None.
    Returns scalar float32 loss (forward of PiModel with a linear `model`)."""
    B = x.shape[0]
    D, C = w.shape
    Cp = max(128, _round_up(C, 128))            # lane-dense class axis (in-kernel only)

    # Large tensors are passed unpadded; reshapes are free.
    x_flat = x.reshape(B, -1)                   # [B, D], original dtype (cast in-kernel)
    y2 = y.astype(jnp.float32)                  # [B, C]
    mask2 = mask.astype(jnp.float32).reshape(B, 1)

    # Tiny per-class params, padded lane-dense once (cacheable across steps in a real loop).
    w_p = jnp.zeros((D, Cp), jnp.bfloat16).at[:, :C].set(w.astype(jnp.bfloat16))
    b_p = jnp.full((1, Cp), _NEG, jnp.float32).at[0, :C].set(b.astype(jnp.float32))
    if scl_weight is None:
        scl_p = jnp.zeros((1, Cp), jnp.float32).at[0, :C].set(1.0)
    else:
        scl_p = jnp.zeros((1, Cp), jnp.float32).at[0, :C].set(scl_weight.astype(jnp.float32))

    TB = _pick_tb(B, D, Cp)
    G = pl.cdiv(B, TB)

    cost = pl.CostEstimate(
        flops=2 * G * TB * D * Cp,
        transcendentals=2 * G * TB * Cp,
        bytes_accessed=int(x_flat.size * x_flat.dtype.itemsize + w_p.size * 2
                           + (y2.size + b_p.size + mask2.size + scl_p.size) * 4
                           + G * 8 * 128 * 4),
    )

    kernel = functools.partial(_pimodel_kernel, c_real=C, b_real=B)

    partials = pl.pallas_call(
        kernel,
        out_shape=jax.ShapeDtypeStruct((G * 8, 128), jnp.float32),
        grid_spec=pltpu.PrefetchScalarGridSpec(
            num_scalar_prefetch=0,
            grid=(G,),
            in_specs=[
                pl.BlockSpec((TB, D), lambda i: (i, 0)),    # x block (original dtype)
                pl.BlockSpec((D, Cp), lambda i: (0, 0)),    # w (grid-invariant, bf16, padded)
                pl.BlockSpec((1, Cp), lambda i: (0, 0)),    # b (padded with -1e30)
                pl.BlockSpec((TB, C), lambda i: (i, 0)),    # y block (unpadded classes)
                pl.BlockSpec((TB, 1), lambda i: (i, 0)),    # mask block
                pl.BlockSpec((1, Cp), lambda i: (0, 0)),    # scl_weight (padded with 0)
            ],
            out_specs=pl.BlockSpec((8, 128), lambda i: (i, 0)),   # per-block partial sums
            scratch_shapes=[pltpu.VMEM((TB, Cp), jnp.float32)],   # padded teacher-logit tile
        ),
        compiler_params=pltpu.CompilerParams(
            dimension_semantics=("parallel",),              # safe: each block owns its output
            vmem_limit_bytes=48 * 1024 * 1024),
        cost_estimate=cost,
    )(x_flat, w_p, b_p, y2, mask2, scl_p)

    # Tiny final reduction of the per-block partials (1/B already folded in-kernel).
    return jnp.sum(partials.reshape(G, 8, 128)[:, 0, 0])


def _reference(x, y, mask, w, b, scl_weight):
    """Pure-JAX reference of the PyTorch forward (matches the kernel's bf16 MXU operands)."""
    B = x.shape[0]
    x_flat = x.reshape(B, -1)
    logits = jnp.dot(x_flat.astype(jnp.bfloat16), w.astype(jnp.bfloat16),
                     preferred_element_type=jnp.float32) + b
    p_hat = jax.nn.softmax(logits, axis=1)
    p_tgt = jax.nn.softmax(y.astype(jnp.float32), axis=1)
    mse = jnp.mean((p_hat - p_tgt) ** 2, axis=1)
    tw = scl_weight[jnp.argmax(y, axis=1)]
    return jnp.mean(tw * mse * mask)


if __name__ == "__main__":
    key = jax.random.PRNGKey(0)
    kx, ky, km, kw, kb, ks = jax.random.split(key, 6)

    B, Cin, H, W = 8, 4, 16, 16
    C = 10
    D = Cin * H * W

    x = jax.random.normal(kx, (B, Cin, H, W), jnp.float32)        # NCHW, like PyTorch
    y = jax.random.normal(ky, (B, C), jnp.float32)                # teacher logits
    mask = (jax.random.uniform(km, (B,)) > 0.5).astype(jnp.float32)
    w = jax.random.normal(kw, (D, C), jnp.float32) * 0.02         # deterministic "model" params
    b = jax.random.normal(kb, (C,), jnp.float32) * 0.01
    scl_weight = jax.random.uniform(ks, (C,), jnp.float32) + 0.5  # per-class weights

    loss = jax.block_until_ready(pi_model_loss(x, y, mask, w, b, scl_weight))
    ref = _reference(x, y, mask, w, b, scl_weight)
    assert jnp.allclose(loss, ref, atol=1e-6, rtol=1e-3), (loss, ref)

    # also exercise the scl_weight=None branch
    loss_none = jax.block_until_ready(pi_model_loss(x, y, mask, w, b, None))
    ref_none = _reference(x, y, mask, w, b, jnp.ones((C,), jnp.float32))
    assert jnp.allclose(loss_none, ref_none, atol=1e-6, rtol=1e-3), (loss_none, ref_none)

    print("KERNEL_OK")
</pallas_src>

<mosaic_0001>
module attributes {stable_mosaic.version = 11 : i64} {
  func.func @_pimodel_kernel(%arg0: i32, %arg1: memref<8x1024xf32, #tpu.memory_space<vmem>>, %arg2: memref<1024x128xbf16, #tpu.memory_space<vmem>>, %arg3: memref<1x128xf32, #tpu.memory_space<vmem>>, %arg4: memref<8x10xf32, #tpu.memory_space<vmem>>, %arg5: memref<8x1xf32, #tpu.memory_space<vmem>>, %arg6: memref<1x128xf32, #tpu.memory_space<vmem>>, %arg7: memref<8x128xf32, #tpu.memory_space<vmem>>, %arg8: memref<8x128xf32, #tpu.memory_space<vmem>>) attributes {dimension_semantics = [#tpu.dimension_semantics<parallel>], iteration_bounds = array<i64: 1>, scalar_prefetch = 0 : i64, scratch_operands = 1 : i64, tpu.core_type = #tpu.core_type<tc>, window_params = [{transform_indices = @transform_0, window_bounds = array<i64: 8, 1024>}, {pipeline_mode = #tpu.pipeline_mode<synchronous>, transform_indices = @transform_1, window_bounds = array<i64: 1024, 128>}, {pipeline_mode = #tpu.pipeline_mode<synchronous>, transform_indices = @transform_2, window_bounds = array<i64: 1, 128>}, {transform_indices = @transform_3, window_bounds = array<i64: 8, 10>}, {transform_indices = @transform_4, window_bounds = array<i64: 8, 1>}, {pipeline_mode = #tpu.pipeline_mode<synchronous>, transform_indices = @transform_5, window_bounds = array<i64: 1, 128>}, {transform_indices = @transform_6, window_bounds = array<i64: 8, 128>}]} {
    %c8_i32 = arith.constant 8 : i32
    %0 = arith.muli %arg0, %c8_i32 : i32
    %1 = tpu.iota {dimensions = array<i32: 0>} : vector<8x1xi32>
    %2 = vector.broadcast %0 : i32 to vector<8x1xi32>
    %3 = arith.addi %1, %2 : vector<8x1xi32>
    %c8_i32_0 = arith.constant 8 : i32
    %4 = vector.broadcast %c8_i32_0 : i32 to vector<8x1xi32>
    %5 = arith.cmpi slt, %3, %4 : vector<8x1xi32>
    %c0 = arith.constant 0 : index
    %c0_1 = arith.constant 0 : index
    %6 = vector.load %arg1[%c0, %c0_1] : memref<8x1024xf32, #tpu.memory_space<vmem>>, vector<8x1024xf32>
    %cst = arith.constant 0.000000e+00 : f32
    %7 = vector.shape_cast %5 : vector<8x1xi1> to vector<8x1xi1>
    %8 = vector.broadcast %7 : vector<8x1xi1> to vector<8x1024xi1>
    %9 = vector.broadcast %cst : f32 to vector<8x1024xf32>
    %10 = arith.select %8, %6, %9 : vector<8x1024xi1>, vector<8x1024xf32>
    %11 = arith.truncf %10 : vector<8x1024xf32> to vector<8x1024xbf16>
    %c0_2 = arith.constant 0 : index
    %c0_3 = arith.constant 0 : index
    %12 = vector.load %arg2[%c0_2, %c0_3] : memref<1024x128xbf16, #tpu.memory_space<vmem>>, vector<1024x128xbf16>
    %cst_4 = arith.constant dense<0.000000e+00> : vector<8x128xf32>
    %13 = tpu.matmul %11, %12, %cst_4 {dimension_numbers = #tpu.dot_dimension_numbers<[1], [0], [0], [1], [0, 0, 1, 1], [], []>} : vector<8x1024xbf16>, vector<1024x128xbf16>, vector<8x128xf32> -> vector<8x128xf32>
    %c0_5 = arith.constant 0 : index
    %c0_6 = arith.constant 0 : index
    %14 = vector.load %arg3[%c0_5, %c0_6] : memref<1x128xf32, #tpu.memory_space<vmem>>, vector<1x128xf32>
    %15 = vector.broadcast %14 : vector<1x128xf32> to vector<8x128xf32>
    %16 = arith.addf %13, %15 : vector<8x128xf32>
    %cst_7 = arith.constant -1.000000e+30 : f32
    %17 = vector.broadcast %cst_7 : f32 to vector<8x128xf32>
    %c0_8 = arith.constant 0 : index
    %c0_9 = arith.constant 0 : index
    %18 = vector.load %arg8[%c0_8, %c0_9] : memref<8x128xf32, #tpu.memory_space<vmem>>, vector<8x128xf32>
    tpu.vector_store %arg8[%c0_8, %c0_9], %17 {strides = array<i32>} : memref<8x128xf32, #tpu.memory_space<vmem>>, vector<8x128xf32>,
    %c0_10 = arith.constant 0 : index
    %c0_11 = arith.constant 0 : index
    %19 = vector.load %arg4[%c0_10, %c0_11] : memref<8x10xf32, #tpu.memory_space<vmem>>, vector<8x10xf32>
    %cst_12 = arith.constant 0.000000e+00 : f32
    %20 = vector.shape_cast %5 : vector<8x1xi1> to vector<8x1xi1>
    %21 = vector.broadcast %20 : vector<8x1xi1> to vector<8x10xi1>
    %22 = vector.broadcast %cst_12 : f32 to vector<8x10xf32>
    %23 = arith.select %21, %19, %22 : vector<8x10xi1>, vector<8x10xf32>
    %c0_13 = arith.constant 0 : index
    %c0_14 = arith.constant 0 : index
    %24 = vector.load %arg8[%c0_13, %c0_14] : memref<8x128xf32, #tpu.memory_space<vmem>>, vector<8x10xf32>
    tpu.vector_store %arg8[%c0_13, %c0_14], %23 {strides = array<i32>} : memref<8x128xf32, #tpu.memory_space<vmem>>, vector<8x10xf32>,
    %c0_15 = arith.constant 0 : index
    %c0_16 = arith.constant 0 : index
    %25 = vector.load %arg8[%c0_15, %c0_16] : memref<8x128xf32, #tpu.memory_space<vmem>>, vector<8x128xf32>
    %cst_17 = arith.constant dense<0xFF800000> : vector<8xf32>
    %26 = vector.multi_reduction <maximumf>, %16, %cst_17 [1] : vector<8x128xf32> to vector<8xf32>
    %27 = vector.shape_cast %26 : vector<8xf32> to vector<8x1xf32>
    %28 = vector.broadcast %27 : vector<8x1xf32> to vector<8x128xf32>
    %29 = arith.subf %16, %28 : vector<8x128xf32>
    %30 = math.exp %29 : vector<8x128xf32>
    %cst_18 = arith.constant dense<0.000000e+00> : vector<8xf32>
    %31 = vector.multi_reduction <add>, %30, %cst_18 [1] : vector<8x128xf32> to vector<8xf32>
    %32 = vector.shape_cast %31 : vector<8xf32> to vector<8x1xf32>
    %33 = vector.broadcast %32 : vector<8x1xf32> to vector<8x128xf32>
    %34 = arith.divf %30, %33 : vector<8x128xf32>
    %cst_19 = arith.constant dense<0xFF800000> : vector<8xf32>
    %35 = vector.multi_reduction <maximumf>, %25, %cst_19 [1] : vector<8x128xf32> to vector<8xf32>
    %36 = vector.shape_cast %35 : vector<8xf32> to vector<8x1xf32>
    %37 = vector.broadcast %36 : vector<8x1xf32> to vector<8x128xf32>
    %38 = arith.subf %25, %37 : vector<8x128xf32>
    %39 = math.exp %38 : vector<8x128xf32>
    %cst_20 = arith.constant dense<0.000000e+00> : vector<8xf32>
    %40 = vector.multi_reduction <add>, %39, %cst_20 [1] : vector<8x128xf32> to vector<8xf32>
    %41 = vector.shape_cast %40 : vector<8xf32> to vector<8x1xf32>
    %42 = vector.broadcast %41 : vector<8x1xf32> to vector<8x128xf32>
    %43 = arith.divf %39, %42 : vector<8x128xf32>
    %44 = arith.subf %34, %43 : vector<8x128xf32>
    %45 = arith.mulf %44, %44 : vector<8x128xf32>
    %cst_21 = arith.constant dense<0.000000e+00> : vector<8xf32>
    %46 = vector.multi_reduction <add>, %45, %cst_21 [1] : vector<8x128xf32> to vector<8xf32>
    %47 = vector.shape_cast %46 : vector<8xf32> to vector<8x1xf32>
    %cst_22 = arith.constant 1.000000e-01 : f32
    %48 = vector.broadcast %cst_22 : f32 to vector<8x1xf32>
    %49 = arith.mulf %47, %48 : vector<8x1xf32>
    %50 = tpu.iota {dimensions = array<i32: 1>} : vector<8x128xi32>
    %cst_23 = arith.constant dense<0xFF800000> : vector<8xf32>
    %51 = vector.multi_reduction <maximumf>, %25, %cst_23 [1] : vector<8x128xf32> to vector<8xf32>
    %52 = vector.shape_cast %51 : vector<8xf32> to vector<8x1xf32>
    %53 = vector.broadcast %52 : vector<8x1xf32> to vector<8x128xf32>
    %54 = arith.cmpf oeq, %25, %53 : vector<8x128xf32>
    %c128_i32 = arith.constant 128 : i32
    %55 = vector.broadcast %c128_i32 : i32 to vector<8x128xi32>
    %56 = arith.select %54, %50, %55 : vector<8x128xi1>, vector<8x128xi32>
    %cst_24 = arith.constant dense<2147483647> : vector<8xi32>
    %57 = vector.multi_reduction <minsi>, %56, %cst_24 [1] : vector<8x128xi32> to vector<8xi32>
    %58 = vector.shape_cast %57 : vector<8xi32> to vector<8x1xi32>
    %59 = vector.broadcast %58 : vector<8x1xi32> to vector<8x128xi32>
    %60 = arith.cmpi eq, %50, %59 : vector<8x128xi32>
    %61 = arith.extui %60 : vector<8x128xi1> to vector<8x128xi32>
    %62 = arith.sitofp %61 : vector<8x128xi32> to vector<8x128xf32>
    %c0_25 = arith.constant 0 : index
    %c0_26 = arith.constant 0 : index
    %63 = vector.load %arg6[%c0_25, %c0_26] : memref<1x128xf32, #tpu.memory_space<vmem>>, vector<1x128xf32>
    %64 = vector.broadcast %63 : vector<1x128xf32> to vector<8x128xf32>
    %65 = arith.mulf %62, %64 : vector<8x128xf32>
    %cst_27 = arith.constant dense<0.000000e+00> : vector<8xf32>
    %66 = vector.multi_reduction <add>, %65, %cst_27 [1] : vector<8x128xf32> to vector<8xf32>
    %67 = vector.shape_cast %66 : vector<8xf32> to vector<8x1xf32>
    %c0_28 = arith.constant 0 : index
    %c0_29 = arith.constant 0 : index
    %68 = vector.load %arg5[%c0_28, %c0_29] : memref<8x1xf32, #tpu.memory_space<vmem>>, vector<8x1xf32>
    %cst_30 = arith.constant 0.000000e+00 : f32
    %69 = vector.broadcast %cst_30 : f32 to vector<8x1xf32>
    %70 = arith.select %5, %68, %69 : vector<8x1xi1>, vector<8x1xf32>
    %71 = arith.mulf %67, %49 : vector<8x1xf32>
    %72 = arith.mulf %71, %70 : vector<8x1xf32>
    %cst_31 = arith.constant dense<0.000000e+00> : vector<1xf32>
    %73 = vector.multi_reduction <add>, %72, %cst_31 [0] : vector<8x1xf32> to vector<1xf32>
    %74 = vector.shape_cast %73 : vector<1xf32> to vector<1x1xf32>
    %cst_32 = arith.constant 1.250000e-01 : f32
    %75 = vector.broadcast %cst_32 : f32 to vector<1x1xf32>
    %76 = arith.mulf %74, %75 : vector<1x1xf32>
    %77 = vector.shape_cast %76 : vector<1x1xf32> to vector<1x1xf32>
    %78 = vector.broadcast %77 : vector<1x1xf32> to vector<8x128xf32>
    %c0_33 = arith.constant 0 : index
    %c0_34 = arith.constant 0 : index
    %79 = vector.load %arg7[%c0_33, %c0_34] : memref<8x128xf32, #tpu.memory_space<vmem>>, vector<8x128xf32>
    tpu.vector_store %arg7[%c0_33, %c0_34], %78 {strides = array<i32>} : memref<8x128xf32, #tpu.memory_space<vmem>>, vector<8x128xf32>,
    return
  }
  func.func @transform_0(%arg0: i32) -> (i32, i32) {
    %c0_i32 = arith.constant 0 : i32
    %c0_i32_0 = arith.constant 0 : i32
    return %arg0, %c0_i32 : i32, i32
  }
  func.func @transform_1(%arg0: i32) -> (i32, i32) {
    %c0_i32 = arith.constant 0 : i32
    %c0_i32_0 = arith.constant 0 : i32
    %c0_i32_1 = arith.constant 0 : i32
    return %c0_i32, %c0_i32_0 : i32, i32
  }
  func.func @transform_2(%arg0: i32) -> (i32, i32) {
    %c0_i32 = arith.constant 0 : i32
    %c0_i32_0 = arith.constant 0 : i32
    %c0_i32_1 = arith.constant 0 : i32
    return %c0_i32, %c0_i32_0 : i32, i32
  }
  func.func @transform_3(%arg0: i32) -> (i32, i32) {
    %c0_i32 = arith.constant 0 : i32
    %c0_i32_0 = arith.constant 0 : i32
    return %arg0, %c0_i32 : i32, i32
  }
  func.func @transform_4(%arg0: i32) -> (i32, i32) {
    %c0_i32 = arith.constant 0 : i32
    %c0_i32_0 = arith.constant 0 : i32
    return %arg0, %c0_i32 : i32, i32
  }
  func.func @transform_5(%arg0: i32) -> (i32, i32) {
    %c0_i32 = arith.constant 0 : i32
    %c0_i32_0 = arith.constant 0 : i32
    %c0_i32_1 = arith.constant 0 : i32
    return %c0_i32, %c0_i32_0 : i32, i32
  }
  func.func @transform_6(%arg0: i32) -> (i32, i32) {
    %c0_i32 = arith.constant 0 : i32
    %c0_i32_0 = arith.constant 0 : i32
    return %arg0, %c0_i32 : i32, i32
  }
}

</mosaic_0001>

<bundles_post_ra>
// kernel: tpu_custom_call.1
= control target key start
LH: loop header
LB: loop body
LE: loop exit
PB: predicated region body
PF: predicated region fallthrough
CT: control target
= control target key end

     0   :  { %11 = vsyncpa [#allocation4], 0  ;;  %s1272_s0 = inlined_call_operand.hbm [shape: f32[8,1024], index: 0, kind: input, shape index: {}]   ;;  %s1273_s1 = inlined_call_operand.hbm [shape: bf16[1024,128], index: 1, kind: input, shape index: {}]   ;;  %s1274_s2 = inlined_call_operand.vmem [shape: f32[1,128], index: 2, kind: input, shape index: {}]   ;;  %s1275_s3 = inlined_call_operand.vmem [shape: f32[8,10], index: 3, kind: input, shape index: {}]   ;;  %s1276_s4 = inlined_call_operand.vmem [shape: f32[8,1], index: 4, kind: input, shape index: {}]   ;;  %s1277_s5 = inlined_call_operand.vmem [shape: f32[1,128], index: 5, kind: input, shape index: {}]   ;;  %s1278_s6 = inlined_call_operand.hbm [shape: f32[8,128], index: 6, kind: output, shape index: {}]  }
   0x1   :  { %12 = vsyncpa [#allocation7], 0 }
   0x2   :  { %13 = vsyncpa [#allocation5], 0  ;;  %s1165_s21 = smov [#allocation3]   ;;  %s1166_s23 = smov [#allocation6]  }
   0x3   :  { %s20_s22 = sshll.u32 %s1165_s21, 4  ;;  %s29_s24 = sshll.u32 %s1166_s23, 4  ;;  %s21_s22 = int_to_ptr.vmem [resolvable:$true] %s20_s22  ;;  %s1208_s24 = int_to_ptr.vmem [resolvable:$true] %s29_s24 }
   0x4   :  { %s1093_s27 = scalar_lea.hbm %s1272_s0, 1024 }
   0x5   :  { %p1094_p0 = scmp.ne.s32.totalorder %s1272_s0, %s1093_s27  ;;  %p1097_p1 = scmp.lt.u32.totalorder %s1093_s27, %s1272_s0 }
   0x7   :  { %p1099_p2 = pnand %p1097_p1, %p1094_p0 }
   0x9   :  { %1102 = shalt.err (!%p1099_p2)
}
   0xa   :  { %s1103_s8 = scalar_lea.vmem %s21_s22, 1024  ;;  %p1108_p4 = scmp.lt.s32.totalorder %s21_s22, %s21_s22 }
   0xb   :  { %p1104_p3 = scmp.ne.s32.totalorder %s21_s22, %s1103_s8  ;;  %p1109_p5 = scmp.lt.s32.totalorder %s1103_s8, %s1103_s8 }
   0xd   :  { %p1110_p6 = por %p1109_p5, %p1108_p4 }
   0xf   :  { %p1111_p7 = pnand %p1110_p6, %p1104_p3 }
  0x11   :  { %1114 = shalt.err (!%p1111_p7)
}
  0x12   :  { %23 = dma.hbm_to_vmem [thread:$0]  %s1272_s0, 1024, %s21_s22, [#allocation4]  }
  0x13   :  { %s1115_s13 = scalar_lea.hbm %s1273_s1, 8192 }
  0x14   :  { %p1116_p8 = scmp.ne.s32.totalorder %s1273_s1, %s1115_s13  ;;  %p1119_p9 = scmp.lt.u32.totalorder %s1115_s13, %s1273_s1 }
  0x16   :  { %p1121_p10 = pnand %p1119_p9, %p1116_p8 }
  0x18   :  { %1124 = shalt.err (!%p1121_p10)
}
  0x19   :  { %s1125_s18 = scalar_lea.vmem %s1208_s24, 8192  ;;  %p1130_p12 = scmp.lt.s32.totalorder %s1208_s24, %s1208_s24 }
  0x1a   :  { %p1126_p11 = scmp.ne.s32.totalorder %s1208_s24, %s1125_s18  ;;  %p1131_p13 = scmp.lt.s32.totalorder %s1125_s18, %s1125_s18 }
  0x1c   :  { %p1132_p0 = por %p1131_p13, %p1130_p12 }
  0x1e   :  { %p1133_p1 = pnand %p1132_p0, %p1126_p11 }
  0x20   :  { %1136 = shalt.err (!%p1133_p1)
}
  0x21   :  { %s1167_s0 = smov 64   ;;  %s1168_s19 = smov 4  }
  0x22   :  { %35 = dma.hbm_to_vmem [thread:$0]  %s1273_s1, 8192, %s1208_s24, [#allocation7], %s1167_s0, %s1167_s0, %s1168_s19  }
  0x23   :  { %1159 = dma.done.wait [#allocation4], 1024  }
  0x24   :  { %1160 = vsyncadd [#allocation4], 4294966272 }
  0x25   :  { %1161 = dma.done.wait [#allocation7], 8192  }
  0x26   :  { %1162 = vsyncadd [#allocation7], 4294959104  ;;  %v1169_v0 = vmov -1e+30   ;;  %v1021_v1 = vld [vmem:[#allocation6 + $0x40] sm:$0xff]   ;;  %v1025_v5 = vld [vmem:[#allocation6 + $0x48] sm:$0xff]  }
  0x27   :  { %762 = vst [vmem:[#allocation2] sm:$0xff] %v1169_v0  ;;  %v1022_v2 = vld [vmem:[#allocation6 + $0xc0] sm:$0xff]   ;;  %924 = vmatprep.subr.bf16.mxu0 %v1021_v1  ;;  %v1026_v6 = vld [vmem:[#allocation6 + $0xc8] sm:$0xff]   ;;  %v1029_v9 = vld [vmem:[#allocation6 + $0x50] sm:$0xff]   ;;  %vm765_vm0 = vcmask 80896   ;;  %vm826_vm4 = vcmask 7168  }
  0x28   :  { %v1023_v3 = vld [vmem:[#allocation6] sm:$0xff]   ;;  %946 = vmatprep.subr.bf16.mxu1 %v1022_v2  ;;  %v1027_v7 = vld [vmem:[#allocation6 + $0x8] sm:$0xff]   ;;  %v1030_v10 = vld [vmem:[#allocation6 + $0xd0] sm:$0xff]   ;;  %s1172_s26 = smov [#allocation8]  }
  0x29   :  { %v1024_v4 = vld [vmem:[#allocation6 + $0x80] sm:$0xff]   ;;  %925 = vmatpush3.bf16.msra.mxu0 %v1023_v3  ;;  %v1028_v8 = vld [vmem:[#allocation6 + $0x88] sm:$0xff]   ;;  %v1031_v11 = vld [vmem:[#allocation6 + $0x10] sm:$0xff]   ;;  %s847_s27 = sshll.u32 %s1172_s26, 4  ;;  %s848_s27 = int_to_ptr.vmem [resolvable:$true] %s847_s27 }
  0x2a   :  { %947 = vmatpush3.bf16.msra.mxu1 %v1024_v4  ;;  %926 = vmatprep.subr.bf16.mxu0 %v1025_v5  ;;  %v1032_v12 = vld [vmem:[#allocation6 + $0x90] sm:$0xff]   ;;  %v1033_v13 = vld [vmem:[#allocation6 + $0x58] sm:$0xff]   ;;  %v1037_v18 = vld [vmem:[#allocation6 + $0x60] sm:$0xff]   ;;  %s1137_s28 = scalar_lea.vmem %s848_s27, 128  ;;  %p1142_p3 = scmp.lt.s32.totalorder %s848_s27, %s848_s27 }
  0x2b   :  { %948 = vmatprep.subr.bf16.mxu1 %v1026_v6  ;;  %v1034_v14 = vld [vmem:[#allocation6 + $0xd8] sm:$0xff]   ;;  %v1038_v19 = vld [vmem:[#allocation6 + $0xe0] sm:$0xff]   ;;  %v1041_v22 = vld [vmem:[#allocation6 + $0x68] sm:$0xff]   ;;  %p1138_p2 = scmp.ne.s32.totalorder %s848_s27, %s1137_s28  ;;  %p1143_p4 = scmp.lt.s32.totalorder %s1137_s28, %s1137_s28 }
  0x2c   :  { %v1035_v15 = vld [vmem:[#allocation6 + $0x18] sm:$0xff]   ;;  %v1039_v20 = vld [vmem:[#allocation6 + $0x20] sm:$0xff]   ;;  %v1042_v23 = vld [vmem:[#allocation6 + $0xe8] sm:$0xff]  }
  0x2d   :  { %927 = vmatpush3.bf16.msra.mxu0 %v1027_v7  ;;  %v1036_v16 = vld [vmem:[#allocation6 + $0x98] sm:$0xff]   ;;  %v1040_v21 = vld [vmem:[#allocation6 + $0xa0] sm:$0xff]   ;;  %v1043_v24 = vld [vmem:[#allocation6 + $0x28] sm:$0xff]   ;;  %p1144_p5 = por %p1143_p4, %p1142_p3 }
  0x2e   :  { %949 = vmatpush3.bf16.msra.mxu1 %v1028_v8  ;;  %928 = vmatprep.subr.bf16.mxu0 %v1029_v9  ;;  %v763_v17 = vld [vmem:[%s1275_s3] sm:$0xff]  ;;  %v1044_v26 = vld [vmem:[#allocation6 + $0xa8] sm:$0xff]   ;;  %v1045_v27 = vld [vmem:[#allocation6 + $0x70] sm:$0xff]  }
  0x2f   :  { %950 = vmatprep.subr.bf16.mxu1 %v1030_v10  ;;  %766 = vst.msk [vmem:[#allocation2] sm:$0xff] %vm765_vm0, %v763_v17  ;;  %v1046_v28 = vld [vmem:[#allocation6 + $0xf0] sm:$0xff]   ;;  %v1049_v31 = vld [vmem:[#allocation6 + $0x78] sm:$0xff]   ;;  %v58_v35 = vld [vmem:[#allocation3 + $0x8] sm:$0xff]  ;;  %p1145_p6 = pnand %p1144_p5, %p1138_p2 }
  0x30   :  { %v1047_v29 = vld [vmem:[#allocation6 + $0x30] sm:$0xff]   ;;  %v1050_v32 = vld [vmem:[#allocation6 + $0xf8] sm:$0xff]   ;;  %v76_v36 = vpack.c.bf16 %v58_v35, %v58_v35  ;;  %v57_v38 = vld [vmem:[#allocation3] sm:$0xff] }
  0x31   :  { %929 = vmatpush3.bf16.msra.mxu0 %v1031_v11  ;;  %v1048_v30 = vld [vmem:[#allocation6 + $0xb0] sm:$0xff]   ;;  %v1051_v33 = vld [vmem:[#allocation6 + $0x38] sm:$0xff]   ;;  %v75_v41 = vpack.c.bf16 %v57_v38, %v57_v38  ;;  %v1053_v43 = vld [vmem:[#allocation6 + $0x140] sm:$0xff]  }
  0x32   :  { %951 = vmatpush3.bf16.msra.mxu1 %v1032_v12  ;;  %930 = vmatprep.subr.bf16.mxu0 %v1033_v13  ;;  %v1052_v34 = vld [vmem:[#allocation6 + $0xb8] sm:$0xff]   ;;  %v59_v39 = vld [vmem:[#allocation3 + $0x10] sm:$0xff]  ;;  %v1054_v44 = vld [vmem:[#allocation6 + $0x1c0] sm:$0xff]  }
  0x33   :  { %952 = vmatprep.subr.bf16.mxu1 %v1034_v14  ;;  %v60_v37 = vld [vmem:[#allocation3 + $0x18] sm:$0xff]  ;;  %v77_v42 = vpack.c.bf16 %v59_v39, %v59_v39  ;;  %634 = vmatprep.mubr.bf16.mxu0 %v76_v36  ;;  %v1055_v45 = vld [vmem:[#allocation6 + $0x100] sm:$0xff]   ;;  %v1057_v47 = vld [vmem:[#allocation6 + $0x148] sm:$0xff]  }
  0x34   :  { %v78_v40 = vpack.c.bf16 %v60_v37, %v60_v37  ;;  %v1056_v46 = vld [vmem:[#allocation6 + $0x180] sm:$0xff]   ;;  %v1058_v48 = vld [vmem:[#allocation6 + $0x1c8] sm:$0xff]   ;;  %v1061_v51 = vld [vmem:[#allocation6 + $0x150] sm:$0xff]  }
  0x35   :  { %931 = vmatpush3.bf16.msra.mxu0 %v1035_v15  ;;  %v1059_v49 = vld [vmem:[#allocation6 + $0x108] sm:$0xff]   ;;  %v1062_v52 = vld [vmem:[#allocation6 + $0x1d0] sm:$0xff]   ;;  %v1065_v55 = vld [vmem:[#allocation6 + $0x158] sm:$0xff]  }
  0x36   :  { %953 = vmatpush3.bf16.msra.mxu1 %v1036_v16  ;;  %932 = vmatprep.subr.bf16.mxu0 %v1037_v18  ;;  %v1242_v25 = vld [vmem:[#allocation2] sm:$0xff]  ;;  %v1060_v50 = vld [vmem:[#allocation6 + $0x188] sm:$0xff]   ;;  %v1063_v53 = vld [vmem:[#allocation6 + $0x110] sm:$0xff]  }
  0x37   :  { %954 = vmatprep.subr.bf16.mxu1 %v1038_v19  ;;  %777 = vmax.xlane.f32.xlu0 %v1242_v25  ;;  %v1064_v54 = vld [vmem:[#allocation6 + $0x190] sm:$0xff]   ;;  %v1066_v56 = vld [vmem:[#allocation6 + $0x1d8] sm:$0xff]   ;;  %v1069_v59 = vld [vmem:[#allocation6 + $0x160] sm:$0xff]   ;;  %v791_v19 = vlaneseq }
  0x38   :  { %674 = vmatprep.mubr.bf16.mxu1 %v78_v40  ;;  %v1067_v57 = vld [vmem:[#allocation6 + $0x118] sm:$0xff]   ;;  %v1070_v60 = vld [vmem:[#allocation6 + $0x1e0] sm:$0xff]   ;;  %v1073_v63 = vld [vmem:[#allocation6 + $0x168] sm:$0xff]  }
  0x39   :  { %933 = vmatpush3.bf16.msra.mxu0 %v1039_v20  ;;  %v1068_v58 = vld [vmem:[#allocation6 + $0x198] sm:$0xff]   ;;  %v1071_v61 = vld [vmem:[#allocation6 + $0x120] sm:$0xff]   ;;  %v1074_v0 = vld [vmem:[#allocation6 + $0x1e8] sm:$0xff]   ;;  %v1245_v20 = vand.u32 127, %v791_v19 }
  0x3a   :  { %955 = vmatpush3.bf16.msra.mxu1 %v1040_v21  ;;  %934 = vmatprep.subr.bf16.mxu0 %v1041_v22  ;;  %v1072_v62 = vld [vmem:[#allocation6 + $0x1a0] sm:$0xff]   ;;  %v1075_v1 = vld [vmem:[#allocation6 + $0x128] sm:$0xff]   ;;  %v1077_v3 = vld [vmem:[#allocation6 + $0x170] sm:$0xff]  }
  0x3b   :  { %956 = vmatprep.subr.bf16.mxu1 %v1042_v23  ;;  %v1076_v2 = vld [vmem:[#allocation6 + $0x1a8] sm:$0xff]   ;;  %v1078_v4 = vld [vmem:[#allocation6 + $0x1f0] sm:$0xff]   ;;  %v1081_v7 = vld [vmem:[#allocation6 + $0x178] sm:$0xff]  }
  0x3c   :  { %v1079_v5 = vld [vmem:[#allocation6 + $0x130] sm:$0xff]   ;;  %v1082_v8 = vld [vmem:[#allocation6 + $0x1f8] sm:$0xff]   ;;  %v62_v11 = vld [vmem:[#allocation3 + $0x28] sm:$0xff] }
  0x3d   :  { %935 = vmatpush3.bf16.msra.mxu0 %v1043_v24  ;;  %v1080_v6 = vld [vmem:[#allocation6 + $0x1b0] sm:$0xff]   ;;  %v1083_v9 = vld [vmem:[#allocation6 + $0x138] sm:$0xff]   ;;  %v61_v13 = vld [vmem:[#allocation3 + $0x20] sm:$0xff]  ;;  %v80_v14 = vpack.c.bf16 %v62_v11, %v62_v11 }
  0x3e   :  { %957 = vmatpush3.bf16.msra.mxu1 %v1044_v26  ;;  %936 = vmatprep.subr.bf16.mxu0 %v1045_v27  ;;  %v1084_v10 = vld [vmem:[#allocation6 + $0x1b8] sm:$0xff]   ;;  %v79_v16 = vpack.c.bf16 %v61_v13, %v61_v13  ;;  %v63_v17 = vld [vmem:[#allocation3 + $0x30] sm:$0xff] }
  0x3f   :  { %958 = vmatprep.subr.bf16.mxu1 %v1046_v28  ;;  %v64_v12 = vld [vmem:[#allocation3 + $0x38] sm:$0xff]  ;;  %v81_v18 = vpack.c.bf16 %v63_v17, %v63_v17 }
  0x40   :  { %v82_v15 = vpack.c.bf16 %v64_v12, %v64_v12  ;;  %v857_v28 = vld [vmem:[%s1274_s2] ss:$0 sm:$0xff] }
  0x41   :  { %937 = vmatpush3.bf16.msra.mxu0 %v1047_v29 }
  0x42   :  { %959 = vmatpush3.bf16.msra.mxu1 %v1048_v30  ;;  %938 = vmatprep.subr.bf16.mxu0 %v1049_v31 }
  0x43   :  { %960 = vmatprep.subr.bf16.mxu1 %v1050_v32 }
  0x45   :  { %939 = vmatpush3.bf16.msra.mxu0 %v1051_v33 }
  0x46   :  { %961 = vmatpush3.bf16.msra.mxu1 %v1052_v34  ;;  %968 = vmatprep.subr.bf16.mxu0 %v1053_v43 }
  0x47   :  { %990 = vmatprep.subr.bf16.mxu1 %v1054_v44 }
  0x48   :  { %635 = vmatmul.mubr.bf16.vlgmr.msra.gmra.mrb[0].mxu0 %v75_v41 }
  0x49   :  { %675 = vmatmul.mubr.bf16.vlgmr.msra.gmra.mrb[0].mxu1 %v77_v42  ;;  %969 = vmatpush3.bf16.msra.mxu0 %v1055_v45 }
  0x4a   :  { %991 = vmatpush3.bf16.msra.mxu1 %v1056_v46  ;;  %970 = vmatprep.subr.bf16.mxu0 %v1057_v47 }
  0x4b   :  { %992 = vmatprep.subr.bf16.mxu1 %v1058_v48  ;;  %714 = vmatprep.mubr.bf16.mxu0 %v80_v14  ;;  %v1171_v14 = vmov 0  }
  0x4c   :  { %754 = vmatprep.mubr.bf16.mxu1 %v82_v15  ;;  %1020 = vset.pattern.permute.xlu0 %v1171_v14 }
  0x4d   :  { %971 = vmatpush3.bf16.msra.mxu0 %v1059_v49 }
  0x4e   :  { %993 = vmatpush3.bf16.msra.mxu1 %v1060_v50  ;;  %972 = vmatprep.subr.bf16.mxu0 %v1061_v51 }
  0x4f   :  { %994 = vmatprep.subr.bf16.mxu1 %v1062_v52 }
  0x51   :  { %973 = vmatpush3.bf16.msra.mxu0 %v1063_v53 }
  0x52   :  { %995 = vmatpush3.bf16.msra.mxu1 %v1064_v54  ;;  %974 = vmatprep.subr.bf16.mxu0 %v1065_v55 }
  0x53   :  { %996 = vmatprep.subr.bf16.mxu1 %v1066_v56 }
  0x55   :  { %975 = vmatpush3.bf16.msra.mxu0 %v1067_v57 }
  0x56   :  { %997 = vmatpush3.bf16.msra.mxu1 %v1068_v58  ;;  %976 = vmatprep.subr.bf16.mxu0 %v1069_v59 }
  0x57   :  { %998 = vmatprep.subr.bf16.mxu1 %v1070_v60 }
  0x59   :  { %977 = vmatpush3.bf16.msra.mxu0 %v1071_v61 }
  0x5a   :  { %999 = vmatpush3.bf16.msra.mxu1 %v1072_v62  ;;  %978 = vmatprep.subr.bf16.mxu0 %v1073_v63 }
  0x5b   :  { %1000 = vmatprep.subr.bf16.mxu1 %v1074_v0 }
  0x5d   :  { %979 = vmatpush3.bf16.msra.mxu0 %v1075_v1 }
  0x5e   :  { %1001 = vmatpush3.bf16.msra.mxu1 %v1076_v2  ;;  %980 = vmatprep.subr.bf16.mxu0 %v1077_v3 }
  0x5f   :  { %1002 = vmatprep.subr.bf16.mxu1 %v1078_v4  ;;  %v923_v4 = vld [vmem:[%s1277_s5] ss:$0 sm:$0xff] }
  0x61   :  { %981 = vmatpush3.bf16.msra.mxu0 %v1079_v5 }
  0x62   :  { %1003 = vmatpush3.bf16.msra.mxu1 %v1080_v6  ;;  %982 = vmatprep.subr.bf16.mxu0 %v1081_v7  ;;  %v1170_v6 = vmov 0.0  }
  0x63   :  { %1004 = vmatprep.subr.bf16.mxu1 %v1082_v8 }
  0x65   :  { %983 = vmatpush3.bf16.msra.mxu0 %v1083_v9 }
  0x66   :  { %1005 = vmatpush3.bf16.msra.mxu1 %v1084_v10 }
  0x68   :  { %715 = vmatmul.mubr.bf16.vlgmr.msra.gmra.mrb[4].mxu0 %v79_v16 }
  0x69   :  { %755 = vmatmul.mubr.bf16.vlgmr.msra.gmra.mrb[4].mxu1 %v81_v18  ;;  %v822_v18 = vld [vmem:[%s1276_s4] sm:$0xff] }
  0xc4   :  { %v778_v21 = vpop.xlane.xlu0 %777 }
  0xc5   :  { %vm793_vm1 = vcmp.eq.f32.partialorder %v1242_v25, %v778_v21  ;;  %v779_v39 = vsub.f32 %v1242_v25, %v778_v21 }
  0xc6   :  { %v794_v22 = vsel %vm793_vm1, %v1245_v20, 128 }
  0xc7   :  { %v796_v23 = vshra.s32 %v794_v22, 16  ;;  %v780_v40 = vmul.f32 1.442695, %v779_v39  ;;  %v795_v56 = vand.u32 65535, %v794_v22 }
  0xc9   :  { %v798_v24 = vcvt.s32.f32 %v796_v23  ;;  %1085 = vpow2.f32 %v780_v40  ;;  %v797_v59 = vcvt.s32.f32 %v795_v56 }
  0xcb   :  { %799 = vmin.xlane.f32.xlu1 %v798_v24 }
  0xd3   :  { %v1086_v53 = vpop.eup %1085 }
 0x11b   :  { %v940_v26 = vpop.f32.mrb[0].mxu0 }
 0x11c   :  { %v962_v27 = vpop.f32.mrb[0].mxu1  ;;  %v941_v29 = vpop.f32.mrb[1].mxu0 }
 0x11d   :  { %v942_v30 = vadd.f32 %v941_v29, %v940_v26  ;;  %v963_v31 = vpop.f32.mrb[1].mxu1  ;;  %v943_v32 = vpop.f32.mrb[2].mxu0 }
 0x11e   :  { %v964_v33 = vadd.f32 %v963_v31, %v962_v27  ;;  %v965_v34 = vpop.f32.mrb[2].mxu1  ;;  %v944_v35 = vpop.f32.mrb[3].mxu0 }
 0x11f   :  { %v637_v36 = vadd.f32 %v942_v30, %v857_v28  ;;  %v966_v37 = vpop.f32.mrb[3].mxu1 }
 0x121   :  { %v677_v38 = vadd.f32 %v964_v33, %v637_v36 }
 0x13b   :  { %v984_v41 = vpop.f32.mrb[4].mxu0 }
 0x13c   :  { %v1006_v42 = vpop.f32.mrb[4].mxu1  ;;  %v985_v43 = vpop.f32.mrb[5].mxu0 }
 0x13d   :  { %v1007_v44 = vpop.f32.mrb[5].mxu1  ;;  %v986_v45 = vadd.f32 %v985_v43, %v984_v41  ;;  %v987_v47 = vpop.f32.mrb[6].mxu0 }
 0x13e   :  { %v1008_v46 = vadd.f32 %v1007_v44, %v1006_v42  ;;  %v1009_v48 = vpop.f32.mrb[6].mxu1  ;;  %v988_v49 = vpop.f32.mrb[7].mxu0 }
 0x13f   :  { %v1010_v50 = vpop.f32.mrb[7].mxu1  ;;  %v717_v51 = vadd.f32 %v986_v45, %v677_v38 }
 0x141   :  { %v757_v52 = vadd.f32 %v1008_v46, %v717_v51 }
 0x143   :  { %768 = vmax.xlane.f32.xlu0 %v757_v52 }
 0x147   :  { %782 = vadd.xlane.f32.xlu0 %v1086_v53 }
 0x158   :  { %v800_v57 = vpop.xlane.xlu1 %799 }
 0x159   :  { %vm801_vm2 = vcmp.eq.f32.partialorder %v798_v24, %v800_v57  ;;  %v806_v63 = vcvt.f32.s32 %v800_v57 }
 0x15a   :  { %v802_v60 = vsel %vm801_vm2, %v797_v59, inf }
 0x15b   :  { %v807_v1 = vshll.u32 %v806_v63, 16 }
 0x1d0   :  { %v769_v54 = vpop.xlane.xlu0 %768 }
 0x1d1   :  { %v770_v55 = vsub.f32 %v757_v52, %v769_v54 }
 0x1d3   :  { %v771_v25 = vmul.f32 1.442695, %v770_v55 }
 0x1d4   :  { %v783_v61 = vpop.xlane.xlu0 %782 }
 0x1d5   :  { %1087 = vpow2.f32 %v771_v25 }
 0x1d6   :  { %1089 = vrcp.f32 %v783_v61 }
 0x1df   :  { %v1088_v58 = vpop.eup %1087 }
 0x1e0   :  { %773 = vadd.xlane.f32.xlu1 %v1088_v58  ;;  %v1090_v5 = vpop.eup %1089 }
 0x1e1   :  { %v785_v11 = vmul.f32 %v1090_v5, %v1086_v53 }
 0x1e4   :  { %803 = vmin.xlane.f32.xlu1 %v802_v60 }
 0x26d   :  { %v774_v62 = vpop.xlane.xlu1 %773 }
 0x26e   :  { %1091 = vrcp.f32 %v774_v62 }
 0x271   :  { %v804_v0 = vpop.xlane.xlu1 %803 }
 0x272   :  { %v805_v2 = vcvt.f32.s32 %v804_v0 }
 0x274   :  { %v808_v3 = vadd.s32 %v807_v1, %v805_v2 }
 0x276   :  { %vm809_vm3 = vcmp.eq.s32.totalorder %v1245_v20, %v808_v3 }
 0x277   :  { %v922_v7 = vsel %vm809_vm3, 1.0, %v1170_v6 }
 0x278   :  { %v1092_v8 = vpop.eup %1091  ;;  %v819_v9 = vmul.f32 %v923_v4, %v922_v7 }
 0x279   :  { %v776_v10 = vmul.f32 %v1092_v8, %v1088_v58 }
 0x27a   :  { %820 = vadd.xlane.f32.xlu1 %v819_v9 }
 0x27b   :  { %v786_v12 = vsub.f32 %v776_v10, %v785_v11 }
 0x27d   :  { %v787_v13 = vmul.f32 %v786_v12, %v786_v12 }
 0x27f   :  { %788 = vadd.xlane.f32.xlu0 %v787_v13 }
 0x307   :  { %v821_v17 = vpop.xlane.xlu1 %820 }
 0x30c   :  { %v789_v15 = vpop.xlane.xlu0 %788 }
 0x30d   :  { %v790_v16 = vmul.f32 0.1, %v789_v15 }
 0x30f   :  { %v824_v19 = vmul.f32 %v821_v17, %v790_v16 }
 0x311   :  { %v825_v20 = vmul.f32 %v824_v19, %v822_v18 }
 0x313   :  { %v827_v21 = vsel %vm826_vm4, %v825_v20, 0.0 }
 0x314   :  { %v828_v22 = vrot.slane %v827_v21, 4 }
 0x316   :  { %v829_v23 = vadd.f32 %v828_v22, %v827_v21 }
 0x318   :  { %v830_v24 = vrot.slane %v829_v23, 2 }
 0x31a   :  { %v831_v26 = vadd.f32 %v830_v24, %v829_v23 }
 0x31c   :  { %v832_v27 = vrot.slane %v831_v26, 1 }
 0x31e   :  { %v833_v28 = vadd.f32 %v832_v27, %v831_v26 }
 0x320   :  { %v834_v29 = vmul.f32 0.125, %v833_v28 }
 0x322   :  { %837 = vperm.xlu0 %1020, %v834_v29  }
 0x3a1   :  { %v838_v30 = vpop.permute.xlu0 %837 }
 0x3a2   :  { %840 = vst [vmem:[#allocation8] sm:$0xff] %v838_v30 }
 0x3a3   :  { %1148 = shalt.err (!%p1145_p6)
}
 0x3a4   :  { %s1149_s30 = scalar_lea.hbm %s1278_s6, 128 }
 0x3a5   :  { %p1150_p7 = scmp.ne.s32.totalorder %s1278_s6, %s1149_s30  ;;  %p1153_p8 = scmp.lt.u32.totalorder %s1149_s30, %s1278_s6 }
 0x3a7   :  { %p1155_p9 = pnand %p1153_p8, %p1150_p7 }
 0x3a9   :  { %1158 = shalt.err (!%p1155_p9)
}
 0x3aa   :  { %850 = dma.vmem_to_hbm [thread:$0]  %s848_s27, 128, %s1278_s6, [#allocation5]  }
 0x3ab   :  { %1163 = dma.done.wait [#allocation5], 128  }
 0x3ac   :  { %1164 = vsyncadd [#allocation5], 4294967168 }
 0x3ad   :  { %854 = vsyncpa [#allocation4], 1 }
 0x3ae   :  { %855 = vsyncpa [#allocation7], 1 }
 0x3af   :  { %856 = vsyncpa [#allocation5], 1 }

</bundles_post_ra>
